<compile_context>
chip_gen: v7x
topology: tpu7x:2x2x1
jax: 0.10.0
libtpu: 0.0.40
codegen_flags: <defaults>
</compile_context>

<pallas_src>
import jax
import jax.numpy as jnp
import numpy as np
from jax.experimental import pallas as pl
from jax.experimental.pallas import tpu as pltpu


def _round_up(a: int, b: int) -> int:
    return -(-a // b) * b


def _deg_kernel(edge_dst_ref, dis_ref):
    """Accumulate in-degree for this node row tile; convert to deg^-1/2 on the last chunk."""
    ek = pl.program_id(1)

    @pl.when(ek == 0)
    def _init():
        dis_ref[...] = jnp.zeros_like(dis_ref)

    n_tile = dis_ref.shape[0]
    e_k = edge_dst_ref.shape[1]
    row_base = pl.program_id(0) * n_tile
    row_ids = row_base + jax.lax.broadcasted_iota(jnp.int32, (n_tile, e_k), 0)
    onehot_i = (row_ids == edge_dst_ref[...]).astype(jnp.float32)        # (n_tile, e_k)
    dis_ref[...] += jnp.sum(onehot_i, axis=1, keepdims=True)

    @pl.when(ek == pl.num_programs(1) - 1)
    def _finish():
        deg = dis_ref[...]
        # clamp to 0 for deg == 0 (see NOTE above); finite otherwise, matches deg**-0.5
        dis_ref[...] = jnp.where(deg > 0.0, jax.lax.rsqrt(deg), 0.0)


def _gcn_agg_kernel(edge_dst_ref, edge_src_ref, x_ref, dis_all_ref, dis_row_ref,
                    out_ref, acc_ref):
    """acc[r,:] += sum_e [i_e == row r] * (dis[j_e] * x[j_e, :]) ; epilogue: relu(dis_r*acc)."""
    ek = pl.program_id(2)

    @pl.when(ek == 0)
    def _init():
        acc_ref[...] = jnp.zeros_like(acc_ref)

    n_tile, _ = acc_ref.shape
    e_k = edge_dst_ref.shape[1]
    n_all = x_ref.shape[0]

    # node-wise pre-scale by deg^-1/2 of the source node (VPU broadcast, overlaps MXU work)
    x_scaled = dis_all_ref[...] * x_ref[...].astype(jnp.float32)         # (n_all, f_tile)

    # gather: onehot_jT[e, n] = 1 iff edge e has source n  ->  gathered[e,:] = x_scaled[j_e,:]
    col_ids = jax.lax.broadcasted_iota(jnp.int32, (e_k, n_all), 1)
    onehot_jT = (col_ids == edge_src_ref[...]).astype(jnp.float32)       # (e_k, n_all)
    gathered = jnp.dot(onehot_jT, x_scaled,
                       preferred_element_type=jnp.float32)               # (e_k, f_tile)

    # scatter-add: onehot_i[r, e] = 1 iff edge e targets global row (row_base + r)
    row_base = pl.program_id(0) * n_tile
    row_ids = row_base + jax.lax.broadcasted_iota(jnp.int32, (n_tile, e_k), 0)
    onehot_i = (row_ids == edge_dst_ref[...]).astype(jnp.float32)        # (n_tile, e_k)
    acc_ref[...] += jnp.dot(onehot_i, gathered,
                            preferred_element_type=jnp.float32)

    @pl.when(ek == pl.num_programs(2) - 1)
    def _finish():
        out = dis_row_ref[...] * acc_ref[...]                            # post-scale (target)
        out_ref[...] = jnp.maximum(out, 0.0).astype(out_ref.dtype)


def gcn_rel_forward(x, edge_index, line_graph_val=None, *,
                    n_tile=256, e_tile=512, f_tile=256):
    """Pallas implementation of GCN_Rel.forward. line_graph_val is unused (as in torch)."""
    del line_graph_val
    x = jnp.asarray(x)
    edge_index = jnp.asarray(edge_index).astype(jnp.int32)
    N, F = x.shape
    E = edge_index.shape[1]
    dtype = x.dtype

    # ---- tile sizes (128-aligned, clamped to the problem) & padding -------------------
    f_tile = min(f_tile, _round_up(F, 128))
    e_tile = min(e_tile, _round_up(E, 128))
    E_pad = _round_up(E, e_tile)
    need_dummy = E_pad > E                     # padded edges point at a dummy node (= N)
    n_tile = min(n_tile, _round_up(N + (1 if need_dummy else 0), 128))
    N_pad = _round_up(N + (1 if need_dummy else 0), n_tile)
    F_pad = _round_up(F, f_tile)

    xp = jnp.zeros((N_pad, F_pad), dtype).at[:N, :F].set(x)
    src = jnp.full((E_pad,), N, jnp.int32).at[:E].set(edge_index[0])
    dst = jnp.full((E_pad,), N, jnp.int32).at[:E].set(edge_index[1])
    dst_row = dst.reshape(1, E_pad)            # target indices i, row-oriented
    src_col = src.reshape(E_pad, 1)            # source indices j, column-oriented

    n_grid = N_pad // n_tile
    e_grid = E_pad // e_tile
    f_grid = F_pad // f_tile

    # ---- pre-pass: dis = deg^-1/2 (clamped to 0 where deg == 0) -----------------------
    dis = pl.pallas_call(
        _deg_kernel,
        out_shape=jax.ShapeDtypeStruct((N_pad, 1), jnp.float32),
        grid_spec=pltpu.PrefetchScalarGridSpec(
            num_scalar_prefetch=0,
            grid=(n_grid, e_grid),
            in_specs=[pl.BlockSpec((1, e_tile), lambda ni, ek: (0, ek))],
            out_specs=pl.BlockSpec((n_tile, 1), lambda ni, ek: (ni, 0)),
        ),
        compiler_params=pltpu.CompilerParams(
            dimension_semantics=("parallel", "arbitrary")),
    )(dst_row)

    # ---- main aggregation kernel -------------------------------------------------------
    cost = pl.CostEstimate(
        flops=int(2 * E_pad * F_pad * N_pad * (n_grid + 1)),
        transcendentals=0,
        bytes_accessed=int(4 * (n_grid * N_pad * F_pad       # x re-read per row tile
                                + N_pad * F_pad              # output
                                + 2 * N_pad                  # dis (both views)
                                + 2 * E_pad * n_grid * f_grid)),  # edge chunks
    )

    out_p = pl.pallas_call(
        _gcn_agg_kernel,
        out_shape=jax.ShapeDtypeStruct((N_pad, F_pad), dtype),
        grid_spec=pltpu.PrefetchScalarGridSpec(
            num_scalar_prefetch=0,
            grid=(n_grid, f_grid, e_grid),                   # edge-chunk reduction axis last
            in_specs=[
                pl.BlockSpec((1, e_tile), lambda ni, fi, ek: (0, ek)),      # edge targets i
                pl.BlockSpec((e_tile, 1), lambda ni, fi, ek: (ek, 0)),      # edge sources j
                pl.BlockSpec((N_pad, f_tile), lambda ni, fi, ek: (0, fi)),  # x (all nodes, F tile)
                pl.BlockSpec((N_pad, 1), lambda ni, fi, ek: (0, 0)),        # dis, all nodes
                pl.BlockSpec((n_tile, 1), lambda ni, fi, ek: (ni, 0)),      # dis, this row tile
            ],
            out_specs=pl.BlockSpec((n_tile, f_tile), lambda ni, fi, ek: (ni, fi)),
            scratch_shapes=[pltpu.VMEM((n_tile, f_tile), jnp.float32)],
        ),
        compiler_params=pltpu.CompilerParams(
            dimension_semantics=("parallel", "parallel", "arbitrary"),
            vmem_limit_bytes=64 * 1024 * 1024),
        cost_estimate=cost,
    )(dst_row, src_col, xp, dis, dis)

    return out_p[:N, :F]


def _reference(x, edge_index):
    # Plain-JAX reference mirroring the torch semantics (scatter-add spmm + relu).
    N = x.shape[0]
    ej, ei = edge_index[0], edge_index[1]
    deg = jnp.zeros((N,), x.dtype).at[ei].add(1.0)
    dis = deg ** -0.5
    norm = dis[ej] * dis[ei]
    out = jnp.zeros_like(x).at[ei].add(norm[:, None] * x[ej])
    return jnp.maximum(out, 0.0)


if __name__ == "__main__":
    key = jax.random.PRNGKey(0)
    N, F, E = 16, 32, 48

    kx, ks, kd = jax.random.split(key, 3)
    x = jax.random.normal(kx, (N, F), dtype=jnp.float32)
    src = jax.random.randint(ks, (E,), 0, N, dtype=jnp.int32)
    dst = jax.random.randint(kd, (E,), 0, N, dtype=jnp.int32)
    # ensure every node has at least one incoming edge (deg > 0): the well-posedness
    # assumption of the reference module (deg**-0.5 stays finite).
    dst = dst.at[:N].set(jnp.arange(N, dtype=jnp.int32))
    edge_index = jnp.stack([src, dst], axis=0)          # (2, E): row0 = j (src), row1 = i (dst)

    out = jax.block_until_ready(gcn_rel_forward(x, edge_index))

    ref = _reference(x, edge_index)
    if not np.allclose(np.asarray(out), np.asarray(ref), rtol=1e-5, atol=1e-5):
        raise AssertionError("Pallas GCN_Rel output does not match reference")

    print("KERNEL_OK")
</pallas_src>

<mosaic_0001>
module attributes {stable_mosaic.version = 11 : i64} {
  func.func @_deg_kernel(%arg0: i32, %arg1: i32, %arg2: memref<1x128xi32, #tpu.memory_space<vmem>>, %arg3: memref<128x1xf32, #tpu.memory_space<vmem>>) attributes {dimension_semantics = [#tpu.dimension_semantics<parallel>, #tpu.dimension_semantics<arbitrary>], iteration_bounds = array<i64: 1, 1>, scalar_prefetch = 0 : i64, scratch_operands = 0 : i64, tpu.core_type = #tpu.core_type<tc>, window_params = [{transform_indices = @transform_0, window_bounds = array<i64: 1, 128>}, {transform_indices = @transform_1, window_bounds = array<i64: 128, 1>}]} {
    %c0_i32 = arith.constant 0 : i32
    %0 = arith.cmpi eq, %arg1, %c0_i32 : i32
    %1 = arith.extui %0 : i1 to i32
    %c0_i32_0 = arith.constant 0 : i32
    %2 = arith.cmpi ne, %1, %c0_i32_0 : i32
    scf.if %2 {
      %cst_8 = arith.constant 0.000000e+00 : f32
      %20 = vector.broadcast %cst_8 : f32 to vector<128x1xf32>
      %c0_9 = arith.constant 0 : index
      %c0_10 = arith.constant 0 : index
      %21 = vector.load %arg3[%c0_9, %c0_10] : memref<128x1xf32, #tpu.memory_space<vmem>>, vector<128x1xf32>
      tpu.vector_store %arg3[%c0_9, %c0_10], %20 {strides = array<i32>} : memref<128x1xf32, #tpu.memory_space<vmem>>, vector<128x1xf32>,
    } else {
    }
    %c128_i32 = arith.constant 128 : i32
    %3 = arith.muli %arg0, %c128_i32 : i32
    %4 = tpu.iota {dimensions = array<i32: 0>} : vector<128x128xi32>
    %5 = vector.broadcast %3 : i32 to vector<128x128xi32>
    %6 = arith.addi %5, %4 : vector<128x128xi32>
    %c0 = arith.constant 0 : index
    %c0_1 = arith.constant 0 : index
    %7 = vector.load %arg2[%c0, %c0_1] : memref<1x128xi32, #tpu.memory_space<vmem>>, vector<1x128xi32>
    %8 = vector.broadcast %7 : vector<1x128xi32> to vector<128x128xi32>
    %9 = arith.cmpi eq, %6, %8 : vector<128x128xi32>
    %10 = arith.extui %9 : vector<128x128xi1> to vector<128x128xi32>
    %11 = arith.sitofp %10 : vector<128x128xi32> to vector<128x128xf32>
    %c0_2 = arith.constant 0 : index
    %c0_3 = arith.constant 0 : index
    %12 = vector.load %arg3[%c0_2, %c0_3] : memref<128x1xf32, #tpu.memory_space<vmem>>, vector<128x1xf32>
    %cst = arith.constant dense<0.000000e+00> : vector<128xf32>
    %13 = vector.multi_reduction <add>, %11, %cst [1] : vector<128x128xf32> to vector<128xf32>
    %14 = vector.shape_cast %13 : vector<128xf32> to vector<128x1xf32>
    %15 = arith.addf %12, %14 : vector<128x1xf32>
    %c0_4 = arith.constant 0 : index
    %c0_5 = arith.constant 0 : index
    %16 = vector.load %arg3[%c0_4, %c0_5] : memref<128x1xf32, #tpu.memory_space<vmem>>, vector<128x1xf32>
    tpu.vector_store %arg3[%c0_4, %c0_5], %15 {strides = array<i32>} : memref<128x1xf32, #tpu.memory_space<vmem>>, vector<128x1xf32>,
    %c0_i32_6 = arith.constant 0 : i32
    %17 = arith.cmpi eq, %arg1, %c0_i32_6 : i32
    %18 = arith.extui %17 : i1 to i32
    %c0_i32_7 = arith.constant 0 : i32
    %19 = arith.cmpi ne, %18, %c0_i32_7 : i32
    scf.if %19 {
      %c0_8 = arith.constant 0 : index
      %c0_9 = arith.constant 0 : index
      %20 = vector.load %arg3[%c0_8, %c0_9] : memref<128x1xf32, #tpu.memory_space<vmem>>, vector<128x1xf32>
      %cst_10 = arith.constant 0.000000e+00 : f32
      %21 = vector.broadcast %cst_10 : f32 to vector<128x1xf32>
      %22 = arith.cmpf ogt, %20, %21 : vector<128x1xf32>
      %23 = math.rsqrt %20 : vector<128x1xf32>
      %cst_11 = arith.constant 0.000000e+00 : f32
      %24 = vector.broadcast %cst_11 : f32 to vector<128x1xf32>
      %25 = arith.select %22, %23, %24 : vector<128x1xi1>, vector<128x1xf32>
      %c0_12 = arith.constant 0 : index
      %c0_13 = arith.constant 0 : index
      %26 = vector.load %arg3[%c0_12, %c0_13] : memref<128x1xf32, #tpu.memory_space<vmem>>, vector<128x1xf32>
      tpu.vector_store %arg3[%c0_12, %c0_13], %25 {strides = array<i32>} : memref<128x1xf32, #tpu.memory_space<vmem>>, vector<128x1xf32>,
    } else {
    }
    return
  }
  func.func @transform_0(%arg0: i32, %arg1: i32) -> (i32, i32) {
    %c0_i32 = arith.constant 0 : i32
    %c0_i32_0 = arith.constant 0 : i32
    return %c0_i32, %arg1 : i32, i32
  }
  func.func @transform_1(%arg0: i32, %arg1: i32) -> (i32, i32) {
    %c0_i32 = arith.constant 0 : i32
    %c0_i32_0 = arith.constant 0 : i32
    return %arg0, %c0_i32 : i32, i32
  }
}

</mosaic_0001>

<bundles_post_ra>
// kernel: tpu_custom_call.1
= control target key start
LH: loop header
LB: loop body
LE: loop exit
PB: predicated region body
PF: predicated region fallthrough
CT: control target
= control target key end

     0   :  { %6 = vsyncpa [#allocation3], 0  ;;  %s373_s6 = smov [#allocation2]   ;;  %s717_s0 = inlined_call_operand.hbm [shape: s32[1,128], index: 0, kind: input, shape index: {}]   ;;  %s718_s1 = inlined_call_operand.vmem [shape: f32[128,1], index: 1, kind: output, shape index: {}]  }
   0x1   :  { %s13_s7 = sshll.u32 %s373_s6, 4  ;;  %s349_s10 = scalar_lea.hbm %s717_s0, 16  ;;  %s14_s7 = int_to_ptr.vmem [resolvable:$true] %s13_s7 }
   0x2   :  { %p350_p0 = scmp.ne.s32.totalorder %s717_s0, %s349_s10  ;;  %p353_p1 = scmp.lt.u32.totalorder %s349_s10, %s717_s0 }
   0x4   :  { %p355_p2 = pnand %p353_p1, %p350_p0 }
   0x6   :  { %358 = shalt.err (!%p355_p2)
}
   0x7   :  { %s359_s15 = scalar_lea.vmem %s14_s7, 16  ;;  %s363_s16 = scalar_lea.vmem %s14_s7, 32 }
   0x8   :  { %p360_p3 = scmp.ne.s32.totalorder %s14_s7, %s359_s15  ;;  %p364_p4 = scmp.lt.s32.totalorder %s14_s7, %s14_s7 }
   0x9   :  { %p365_p5 = scmp.lt.s32.totalorder %s363_s16, %s359_s15 }
   0xb   :  { %p366_p6 = por %p365_p5, %p364_p4 }
   0xd   :  { %p367_p7 = pnand %p366_p6, %p360_p3 }
   0xf   :  { %370 = shalt.err (!%p367_p7)
}
  0x10   :  { %16 = dma.hbm_to_vmem [thread:$0]  %s717_s0, 16, %s14_s7, [#allocation3]  }
  0x11   :  { %371 = dma.done.wait [#allocation3], 16  }
  0x12   :  { %372 = vsyncadd [#allocation3], 4294967280  ;;  %v42_v0 = vlaneseq  ;;  %vm24_vm0 = vcmask 7168   ;;  %v374_v1 = vmov 0.0   ;;  %v298_v6 = vld [vmem:[#allocation2] ss:$0 sm:$0xff] }
  0x13   :  { %27 = vst.msk [vmem:[%s718_s1 + $0x10] sm:$0xff] %vm24_vm0, %v374_v1  ;;  %25 = vst.msk [vmem:[%s718_s1] sm:$0xff] %vm24_vm0, %v374_v1 }
  0x14   :  { %26 = vst.msk [vmem:[%s718_s1 + $0x8] sm:$0xff] %vm24_vm0, %v374_v1  ;;  %28 = vst.msk [vmem:[%s718_s1 + $0x18] sm:$0xff] %vm24_vm0, %v374_v1  ;;  %v43_v2 = vshrl.u32 %v42_v0, 7 }
  0x15   :  { %29 = vst.msk [vmem:[%s718_s1 + $0x20] sm:$0xff] %vm24_vm0, %v374_v1  ;;  %30 = vst.msk [vmem:[%s718_s1 + $0x28] sm:$0xff] %vm24_vm0, %v374_v1 }
  0x16   :  { %31 = vst.msk [vmem:[%s718_s1 + $0x30] sm:$0xff] %vm24_vm0, %v374_v1  ;;  %32 = vst.msk [vmem:[%s718_s1 + $0x38] sm:$0xff] %vm24_vm0, %v374_v1  ;;  %v45_v3 = vadd.s32 16, %v43_v2  ;;  %v46_v4 = vadd.s32 24, %v43_v2  ;;  %v44_v5 = vadd.s32 8, %v43_v2  ;;  %v48_v7 = vadd.s32 40, %v43_v2 }
  0x17   :  { %33 = vst.msk [vmem:[%s718_s1 + $0x40] sm:$0xff] %vm24_vm0, %v374_v1  ;;  %34 = vst.msk [vmem:[%s718_s1 + $0x48] sm:$0xff] %vm24_vm0, %v374_v1  ;;  %v47_v8 = vadd.s32 32, %v43_v2  ;;  %vm81_vm2 = vcmp.eq.s32.totalorder %v43_v2, %v298_v6  ;;  %v50_v13 = vadd.s32 56, %v43_v2  ;;  %v49_v14 = vadd.s32 48, %v43_v2 }
  0x18   :  { %35 = vst.msk [vmem:[%s718_s1 + $0x50] sm:$0xff] %vm24_vm0, %v374_v1  ;;  %36 = vst.msk [vmem:[%s718_s1 + $0x58] sm:$0xff] %vm24_vm0, %v374_v1  ;;  %vm83_vm1 = vcmp.eq.s32.totalorder %v45_v3, %v298_v6  ;;  %vm84_vm3 = vcmp.eq.s32.totalorder %v46_v4, %v298_v6  ;;  %vm82_vm4 = vcmp.eq.s32.totalorder %v44_v5, %v298_v6  ;;  %v299_v10 = vsel %vm81_vm2, 1.0, %v374_v1 }
  0x19   :  { %37 = vst.msk [vmem:[%s718_s1 + $0x60] sm:$0xff] %vm24_vm0, %v374_v1  ;;  %38 = vst.msk [vmem:[%s718_s1 + $0x68] sm:$0xff] %vm24_vm0, %v374_v1  ;;  %v301_v9 = vsel %vm83_vm1, 1.0, %v374_v1  ;;  %145 = vadd.xlane.f32.xlu0 %v299_v10  ;;  %v302_v11 = vsel %vm84_vm3, 1.0, %v374_v1  ;;  %v300_v12 = vsel %vm82_vm4, 1.0, %v374_v1  ;;  %vm86_vm5 = vcmp.eq.s32.totalorder %v48_v7, %v298_v6 }
  0x1a   :  { %39 = vst.msk [vmem:[%s718_s1 + $0x70] sm:$0xff] %vm24_vm0, %v374_v1  ;;  %40 = vst.msk [vmem:[%s718_s1 + $0x78] sm:$0xff] %vm24_vm0, %v374_v1  ;;  %149 = vadd.xlane.f32.xlu1 %v301_v9  ;;  %vm85_vm6 = vcmp.eq.s32.totalorder %v47_v8, %v298_v6  ;;  %v304_v15 = vsel %vm86_vm5, 1.0, %v374_v1  ;;  %vm88_vm7 = vcmp.eq.s32.totalorder %v50_v13, %v298_v6  ;;  %v52_v17 = vadd.s32 72, %v43_v2  ;;  %v131_v35 = vld [vmem:[%s718_s1 + $0x10] sm:$0xff]  ;;  %v129_v36 = vld [vmem:[%s718_s1] sm:$0xff] }
  0x1b   :  { %v303_v16 = vsel %vm85_vm6, 1.0, %v374_v1  ;;  %vm87_vm8 = vcmp.eq.s32.totalorder %v49_v14, %v298_v6  ;;  %v51_v18 = vadd.s32 64, %v43_v2  ;;  %v306_v19 = vsel %vm88_vm7, 1.0, %v374_v1  ;;  %v132_v41 = vld [vmem:[%s718_s1 + $0x18] sm:$0xff]  ;;  %v130_v42 = vld [vmem:[%s718_s1 + $0x8] sm:$0xff] }
  0x1c   :  { %v305_v20 = vsel %vm87_vm8, 1.0, %v374_v1  ;;  %vm90_vm9 = vcmp.eq.s32.totalorder %v52_v17, %v298_v6  ;;  %v54_v21 = vadd.s32 88, %v43_v2  ;;  %v53_v22 = vadd.s32 80, %v43_v2  ;;  %v134_v47 = vld [vmem:[%s718_s1 + $0x28] sm:$0xff]  ;;  %v133_v48 = vld [vmem:[%s718_s1 + $0x20] sm:$0xff] }
  0x1d   :  { %147 = vadd.xlane.f32.xlu0 %v300_v12  ;;  %vm89_vm10 = vcmp.eq.s32.totalorder %v51_v18, %v298_v6  ;;  %v308_v23 = vsel %vm90_vm9, 1.0, %v374_v1  ;;  %v56_v25 = vadd.s32 104, %v43_v2  ;;  %v55_v26 = vadd.s32 96, %v43_v2  ;;  %v136_v53 = vld [vmem:[%s718_s1 + $0x38] sm:$0xff]  ;;  %v135_v56 = vld [vmem:[%s718_s1 + $0x30] sm:$0xff] }
  0x1e   :  { %151 = vadd.xlane.f32.xlu1 %v302_v11  ;;  %v307_v24 = vsel %vm89_vm10, 1.0, %v374_v1  ;;  %vm92_vm11 = vcmp.eq.s32.totalorder %v54_v21, %v298_v6  ;;  %vm91_vm12 = vcmp.eq.s32.totalorder %v53_v22, %v298_v6  ;;  %v58_v29 = vadd.s32 120, %v43_v2  ;;  %v138_v61 = vld [vmem:[%s718_s1 + $0x48] sm:$0xff]  ;;  %v137_v0 = vld [vmem:[%s718_s1 + $0x40] sm:$0xff] }
  0x1f   :  { %v310_v27 = vsel %vm92_vm11, 1.0, %v374_v1  ;;  %v309_v28 = vsel %vm91_vm12, 1.0, %v374_v1  ;;  %vm94_vm13 = vcmp.eq.s32.totalorder %v56_v25, %v298_v6  ;;  %vm93_vm14 = vcmp.eq.s32.totalorder %v55_v26, %v298_v6  ;;  %v140_v5 = vld [vmem:[%s718_s1 + $0x58] sm:$0xff]  ;;  %v139_v8 = vld [vmem:[%s718_s1 + $0x50] sm:$0xff] }
  0x20   :  { %v57_v30 = vadd.s32 112, %v43_v2  ;;  %v312_v31 = vsel %vm94_vm13, 1.0, %v374_v1  ;;  %v311_v32 = vsel %vm93_vm14, 1.0, %v374_v1  ;;  %vm96_vm15 = vcmp.eq.s32.totalorder %v58_v29, %v298_v6  ;;  %v142_v14 = vld [vmem:[%s718_s1 + $0x68] sm:$0xff] }
  0x21   :  { %153 = vadd.xlane.f32.xlu0 %v303_v16  ;;  %v314_v33 = vsel %vm96_vm15, 1.0, %v374_v1  ;;  %v144_v26 = vld [vmem:[%s718_s1 + $0x78] sm:$0xff] }
  0x22   :  { %155 = vadd.xlane.f32.xlu1 %v304_v15  ;;  %vm95_vm1 = vcmp.eq.s32.totalorder %v57_v30, %v298_v6 }
  0x23   :  { %v313_v34 = vsel %vm95_vm1, 1.0, %v374_v1 }
  0x25   :  { %157 = vadd.xlane.f32.xlu0 %v305_v20 }
  0x26   :  { %159 = vadd.xlane.f32.xlu1 %v306_v19  ;;  %v141_v19 = vld [vmem:[%s718_s1 + $0x60] sm:$0xff] }
  0x29   :  { %161 = vadd.xlane.f32.xlu0 %v307_v24 }
  0x2a   :  { %163 = vadd.xlane.f32.xlu1 %v308_v23 }
  0x2d   :  { %165 = vadd.xlane.f32.xlu0 %v309_v28 }
  0x2e   :  { %167 = vadd.xlane.f32.xlu1 %v310_v27 }
  0x31   :  { %169 = vadd.xlane.f32.xlu0 %v311_v32 }
  0x32   :  { %171 = vadd.xlane.f32.xlu1 %v312_v31  ;;  %v143_v31 = vld [vmem:[%s718_s1 + $0x70] sm:$0xff] }
  0x35   :  { %173 = vadd.xlane.f32.xlu0 %v313_v34 }
  0x36   :  { %175 = vadd.xlane.f32.xlu1 %v314_v33 }
  0xa6   :  { %v146_v38 = vpop.xlane.xlu0 %145 }
  0xa7   :  { %v150_v37 = vpop.xlane.xlu1 %149  ;;  %v177_v40 = vadd.f32 %v146_v38, %v129_v36 }
  0xa8   :  { %v179_v39 = vadd.f32 %v150_v37, %v131_v35 }
  0xa9   :  { %194 = vst.msk [vmem:[%s718_s1] sm:$0xff] %vm24_vm0, %v177_v40 }
  0xaa   :  { %196 = vst.msk [vmem:[%s718_s1 + $0x10] sm:$0xff] %vm24_vm0, %v179_v39  ;;  %v148_v44 = vpop.xlane.xlu0 %147 }
  0xab   :  { %v152_v43 = vpop.xlane.xlu1 %151  ;;  %v178_v46 = vadd.f32 %v148_v44, %v130_v42 }
  0xac   :  { %v180_v45 = vadd.f32 %v152_v43, %v132_v41 }
  0xad   :  { %195 = vst.msk [vmem:[%s718_s1 + $0x8] sm:$0xff] %vm24_vm0, %v178_v46 }
  0xae   :  { %197 = vst.msk [vmem:[%s718_s1 + $0x18] sm:$0xff] %vm24_vm0, %v180_v45  ;;  %v154_v50 = vpop.xlane.xlu0 %153 }
  0xaf   :  { %v156_v49 = vpop.xlane.xlu1 %155  ;;  %v181_v52 = vadd.f32 %v154_v50, %v133_v48 }
  0xb0   :  { %v182_v51 = vadd.f32 %v156_v49, %v134_v47  ;;  %v213_v55 = vld [vmem:[%s718_s1] sm:$0xff] }
  0xb1   :  { %v215_v54 = vld [vmem:[%s718_s1 + $0x10] sm:$0xff]  ;;  %198 = vst.msk [vmem:[%s718_s1 + $0x20] sm:$0xff] %vm24_vm0, %v181_v52  ;;  %vm229_vm3 = vcmp.gt.f32.partialorder %v213_v55, 0.0 }
  0xb2   :  { %317 = vrsqrt.f32 %v215_v54  ;;  %199 = vst.msk [vmem:[%s718_s1 + $0x28] sm:$0xff] %vm24_vm0, %v182_v51  ;;  %v158_v58 = vpop.xlane.xlu0 %157  ;;  %vm231_vm2 = vcmp.gt.f32.partialorder %v215_v54, 0.0 }
  0xb3   :  { %319 = vrsqrt.f32 %v213_v55  ;;  %v160_v57 = vpop.xlane.xlu1 %159  ;;  %v183_v60 = vadd.f32 %v158_v58, %v135_v56 }
  0xb4   :  { %v184_v59 = vadd.f32 %v160_v57, %v136_v53  ;;  %v214_v63 = vld [vmem:[%s718_s1 + $0x8] sm:$0xff] }
  0xb5   :  { %v216_v62 = vld [vmem:[%s718_s1 + $0x18] sm:$0xff]  ;;  %200 = vst.msk [vmem:[%s718_s1 + $0x30] sm:$0xff] %vm24_vm0, %v183_v60  ;;  %vm230_vm5 = vcmp.gt.f32.partialorder %v214_v63, 0.0 }
  0xb6   :  { %321 = vrsqrt.f32 %v216_v62  ;;  %201 = vst.msk [vmem:[%s718_s1 + $0x38] sm:$0xff] %vm24_vm0, %v184_v59  ;;  %v162_v2 = vpop.xlane.xlu0 %161  ;;  %vm232_vm4 = vcmp.gt.f32.partialorder %v216_v62, 0.0 }
  0xb7   :  { %323 = vrsqrt.f32 %v214_v63  ;;  %v164_v1 = vpop.xlane.xlu1 %163  ;;  %v185_v4 = vadd.f32 %v162_v2, %v137_v0 }
  0xb8   :  { %v186_v3 = vadd.f32 %v164_v1, %v138_v61  ;;  %v217_v7 = vld [vmem:[%s718_s1 + $0x20] sm:$0xff] }
  0xb9   :  { %v218_v6 = vld [vmem:[%s718_s1 + $0x28] sm:$0xff]  ;;  %202 = vst.msk [vmem:[%s718_s1 + $0x40] sm:$0xff] %vm24_vm0, %v185_v4  ;;  %vm233_vm7 = vcmp.gt.f32.partialorder %v217_v7, 0.0 }
  0xba   :  { %325 = vrsqrt.f32 %v218_v6  ;;  %203 = vst.msk [vmem:[%s718_s1 + $0x48] sm:$0xff] %vm24_vm0, %v186_v3  ;;  %v166_v10 = vpop.xlane.xlu0 %165  ;;  %vm234_vm6 = vcmp.gt.f32.partialorder %v218_v6, 0.0 }
  0xbb   :  { %327 = vrsqrt.f32 %v217_v7  ;;  %v168_v9 = vpop.xlane.xlu1 %167  ;;  %v187_v13 = vadd.f32 %v166_v10, %v139_v8 }
  0xbc   :  { %v318_v11 = vpop.eup %317  ;;  %v188_v12 = vadd.f32 %v168_v9, %v140_v5  ;;  %v219_v18 = vld [vmem:[%s718_s1 + $0x30] sm:$0xff] }
  0xbd   :  { %v320_v15 = vpop.eup %319  ;;  %v263_v16 = vsel %vm231_vm2, %v318_v11, 0.0  ;;  %v220_v17 = vld [vmem:[%s718_s1 + $0x38] sm:$0xff]  ;;  %204 = vst.msk [vmem:[%s718_s1 + $0x50] sm:$0xff] %vm24_vm0, %v187_v13  ;;  %vm235_vm9 = vcmp.gt.f32.partialorder %v219_v18, 0.0 }
  0xbe   :  { %279 = vst.msk [vmem:[%s718_s1 + $0x10] sm:$0xff] %vm24_vm0, %v263_v16  ;;  %v261_v20 = vsel %vm229_vm3, %v320_v15, 0.0  ;;  %329 = vrsqrt.f32 %v220_v17  ;;  %205 = vst.msk [vmem:[%s718_s1 + $0x58] sm:$0xff] %vm24_vm0, %v188_v12  ;;  %v170_v22 = vpop.xlane.xlu0 %169  ;;  %vm236_vm8 = vcmp.gt.f32.partialorder %v220_v17, 0.0 }
  0xbf   :  { %277 = vst.msk [vmem:[%s718_s1] sm:$0xff] %vm24_vm0, %v261_v20  ;;  %331 = vrsqrt.f32 %v219_v18  ;;  %v172_v21 = vpop.xlane.xlu1 %171  ;;  %v189_v25 = vadd.f32 %v170_v22, %v141_v19 }
  0xc0   :  { %v322_v23 = vpop.eup %321  ;;  %v190_v24 = vadd.f32 %v172_v21, %v142_v14  ;;  %v221_v30 = vld [vmem:[%s718_s1 + $0x40] sm:$0xff] }
  0xc1   :  { %v324_v27 = vpop.eup %323  ;;  %v264_v28 = vsel %vm232_vm4, %v322_v23, 0.0  ;;  %v222_v29 = vld [vmem:[%s718_s1 + $0x48] sm:$0xff]  ;;  %206 = vst.msk [vmem:[%s718_s1 + $0x60] sm:$0xff] %vm24_vm0, %v189_v25  ;;  %vm237_vm11 = vcmp.gt.f32.partialorder %v221_v30, 0.0 }
  0xc2   :  { %280 = vst.msk [vmem:[%s718_s1 + $0x18] sm:$0xff] %vm24_vm0, %v264_v28  ;;  %v262_v32 = vsel %vm230_vm5, %v324_v27, 0.0  ;;  %333 = vrsqrt.f32 %v222_v29  ;;  %207 = vst.msk [vmem:[%s718_s1 + $0x68] sm:$0xff] %vm24_vm0, %v190_v24  ;;  %v174_v34 = vpop.xlane.xlu0 %173  ;;  %vm238_vm10 = vcmp.gt.f32.partialorder %v222_v29, 0.0 }
  0xc3   :  { %278 = vst.msk [vmem:[%s718_s1 + $0x8] sm:$0xff] %vm24_vm0, %v262_v32  ;;  %335 = vrsqrt.f32 %v221_v30  ;;  %v176_v33 = vpop.xlane.xlu1 %175  ;;  %v191_v37 = vadd.f32 %v174_v34, %v143_v31 }
  0xc4   :  { %v326_v35 = vpop.eup %325  ;;  %v192_v36 = vadd.f32 %v176_v33, %v144_v26  ;;  %v223_v41 = vld [vmem:[%s718_s1 + $0x50] sm:$0xff] }
  0xc5   :  { %v328_v38 = vpop.eup %327  ;;  %v266_v39 = vsel %vm234_vm6, %v326_v35, 0.0  ;;  %v224_v40 = vld [vmem:[%s718_s1 + $0x58] sm:$0xff]  ;;  %208 = vst.msk [vmem:[%s718_s1 + $0x70] sm:$0xff] %vm24_vm0, %v191_v37  ;;  %vm239_vm13 = vcmp.gt.f32.partialorder %v223_v41, 0.0 }
  0xc6   :  { %282 = vst.msk [vmem:[%s718_s1 + $0x28] sm:$0xff] %vm24_vm0, %v266_v39  ;;  %v265_v42 = vsel %vm233_vm7, %v328_v38, 0.0  ;;  %337 = vrsqrt.f32 %v224_v40  ;;  %209 = vst.msk [vmem:[%s718_s1 + $0x78] sm:$0xff] %vm24_vm0, %v192_v36  ;;  %vm240_vm12 = vcmp.gt.f32.partialorder %v224_v40, 0.0 }
  0xc7   :  { %281 = vst.msk [vmem:[%s718_s1 + $0x20] sm:$0xff] %vm24_vm0, %v265_v42  ;;  %339 = vrsqrt.f32 %v223_v41 }
  0xc8   :  { %v330_v43 = vpop.eup %329  ;;  %v225_v47 = vld [vmem:[%s718_s1 + $0x60] sm:$0xff] }
  0xc9   :  { %v332_v44 = vpop.eup %331  ;;  %v268_v45 = vsel %vm236_vm8, %v330_v43, 0.0  ;;  %v226_v46 = vld [vmem:[%s718_s1 + $0x68] sm:$0xff]  ;;  %vm241_vm15 = vcmp.gt.f32.partialorder %v225_v47, 0.0 }
  0xca   :  { %284 = vst.msk [vmem:[%s718_s1 + $0x38] sm:$0xff] %vm24_vm0, %v268_v45  ;;  %v267_v48 = vsel %vm235_vm9, %v332_v44, 0.0  ;;  %341 = vrsqrt.f32 %v226_v46  ;;  %vm242_vm14 = vcmp.gt.f32.partialorder %v226_v46, 0.0 }
  0xcb   :  { %283 = vst.msk [vmem:[%s718_s1 + $0x30] sm:$0xff] %vm24_vm0, %v267_v48  ;;  %343 = vrsqrt.f32 %v225_v47 }
  0xcc   :  { %v334_v49 = vpop.eup %333  ;;  %v227_v53 = vld [vmem:[%s718_s1 + $0x70] sm:$0xff] }
  0xcd   :  { %v336_v50 = vpop.eup %335  ;;  %v270_v51 = vsel %vm238_vm10, %v334_v49, 0.0  ;;  %v228_v52 = vld [vmem:[%s718_s1 + $0x78] sm:$0xff]  ;;  %vm243_vm2 = vcmp.gt.f32.partialorder %v227_v53, 0.0 }
  0xce   :  { %286 = vst.msk [vmem:[%s718_s1 + $0x48] sm:$0xff] %vm24_vm0, %v270_v51  ;;  %v269_v54 = vsel %vm237_vm11, %v336_v50, 0.0  ;;  %345 = vrsqrt.f32 %v228_v52  ;;  %vm244_vm1 = vcmp.gt.f32.partialorder %v228_v52, 0.0 }
  0xcf   :  { %285 = vst.msk [vmem:[%s718_s1 + $0x40] sm:$0xff] %vm24_vm0, %v269_v54  ;;  %347 = vrsqrt.f32 %v227_v53 }
  0xd0   :  { %v338_v55 = vpop.eup %337 }
  0xd1   :  { %v340_v56 = vpop.eup %339  ;;  %v272_v57 = vsel %vm240_vm12, %v338_v55, 0.0 }
  0xd2   :  { %288 = vst.msk [vmem:[%s718_s1 + $0x58] sm:$0xff] %vm24_vm0, %v272_v57  ;;  %v271_v58 = vsel %vm239_vm13, %v340_v56, 0.0 }
  0xd3   :  { %287 = vst.msk [vmem:[%s718_s1 + $0x50] sm:$0xff] %vm24_vm0, %v271_v58 }
  0xd4   :  { %v342_v59 = vpop.eup %341 }
  0xd5   :  { %v344_v60 = vpop.eup %343  ;;  %v274_v61 = vsel %vm242_vm14, %v342_v59, 0.0 }
  0xd6   :  { %290 = vst.msk [vmem:[%s718_s1 + $0x68] sm:$0xff] %vm24_vm0, %v274_v61  ;;  %v273_v62 = vsel %vm241_vm15, %v344_v60, 0.0 }
  0xd7   :  { %289 = vst.msk [vmem:[%s718_s1 + $0x60] sm:$0xff] %vm24_vm0, %v273_v62 }
  0xd8   :  { %v346_v63 = vpop.eup %345 }
  0xd9   :  { %v348_v0 = vpop.eup %347  ;;  %v276_v1 = vsel %vm244_vm1, %v346_v63, 0.0 }
  0xda   :  { %292 = vst.msk [vmem:[%s718_s1 + $0x78] sm:$0xff] %vm24_vm0, %v276_v1  ;;  %v275_v2 = vsel %vm243_vm2, %v348_v0, 0.0 }
  0xdb   :  { %291 = vst.msk [vmem:[%s718_s1 + $0x70] sm:$0xff] %vm24_vm0, %v275_v2 }
  0xdc   :  { %297 = vsyncpa [#allocation3], 1 }

</bundles_post_ra>
